<compile_context>
chip_gen: v7x
topology: tpu7x:2x2x1
jax: 0.10.0
libtpu: 0.0.40
codegen_flags: <defaults>
</compile_context>

<pallas_src>
import jax
import jax.numpy as jnp
from jax.experimental import pallas as pl
from jax.experimental.pallas import tpu as pltpu

LANES = 128
SUBLANES = 8
MAX_BLOCK_ROWS = 4096   # 4096 x 128 x 4 B = 2 MiB per f32 input tile


def _ceil_div(a, b):
    return -(-a // b)


def _round_up(a, b):
    return _ceil_div(a, b) * b


def _num_tensorcores():
    """Best-effort TensorCore count: 2 on v7x-class chips, else 1."""
    try:
        kind = (getattr(jax.devices()[0], "device_kind", "") or "").lower()
    except Exception:
        kind = ""
    return 2 if "v7" in kind else 1


def _make_kernel(*, weighted, block_rows, steps_per_part, num_blocks,
                 tail_rows, needs_ragged, needs_oob_guard):
    """Builds the reduction kernel (2-input unweighted / 3-input weighted)."""

    def _fold(a):
        # (block_rows, 128) -> (8, 128); pure VPU adds, no XLU.
        return a.reshape(block_rows // SUBLANES, SUBLANES, LANES).sum(axis=0)

    def kernel(*refs):
        if weighted:
            x_ref, y_ref, w_ref, num_ref, den_ref, acc_num, acc_den = refs
        else:
            x_ref, y_ref, num_ref, acc_num = refs
            w_ref = den_ref = acc_den = None

        p = pl.program_id(0)
        i = pl.program_id(1)
        b = p * steps_per_part + i          # logical block index (unclamped)

        @pl.when(i == 0)
        def _():
            acc_num[...] = jnp.zeros_like(acc_num)
            if weighted:
                acc_den[...] = jnp.zeros_like(acc_den)

        def accumulate(masked):
            x = x_ref[...].astype(jnp.float32)
            y = y_ref[...].astype(jnp.float32)
            d = x - y
            num_t = d * d
            if weighted:
                w = w_ref[...].astype(jnp.float32)
                num_t = num_t * w
                den_t = w
            if masked:
                # tail_rows is a static Python int -> cheap compare.
                row = jax.lax.broadcasted_iota(
                    jnp.int32, (block_rows, LANES), 0)
                valid = row < tail_rows
                num_t = jnp.where(valid, num_t, 0.0)
                if weighted:
                    den_t = jnp.where(valid, den_t, 0.0)
            acc_num[...] += _fold(num_t)
            if weighted:
                acc_den[...] += _fold(den_t)

        if not needs_ragged and not needs_oob_guard:
            # Fast path: every block is full and in bounds.
            accumulate(masked=False)
        else:
            last_valid = num_blocks - 1
            full_limit = last_valid if needs_ragged else num_blocks

            @pl.when(b < full_limit)
            def _():
                accumulate(masked=False)

            if needs_ragged:
                @pl.when(b == last_valid)
                def _():
                    accumulate(masked=True)
            # b >= num_blocks (clamped duplicate blocks): contribute nothing.

        @pl.when(i == pl.num_programs(1) - 1)
        def _():
            num_ref[...] = acc_num[...]
            if weighted:
                den_ref[...] = acc_den[...]

    return kernel


def _slab(a, rows, n_main, tail):
    """View the 128-aligned prefix as a (rows, 128) slab (free when tail==0)."""
    flat = a.reshape(-1)
    if tail:
        flat = flat[:n_main]
    return flat.reshape(rows, LANES)


def _tail_sums(x, y, weight, n_main):
    """Reduce the <128-element tail with plain jnp (tiny)."""
    xt = x.reshape(-1)[n_main:].astype(jnp.float32)
    yt = y.reshape(-1)[n_main:].astype(jnp.float32)
    d = xt - yt
    if weight is None:
        return jnp.sum(d * d), None
    wt = weight.reshape(-1)[n_main:].astype(jnp.float32)
    return jnp.sum(d * d * wt), jnp.sum(wt)


def mse_weight_loss(x, y, weight=None):
    """Weighted MSE loss (scalar), matching the PyTorch module's forward."""
    n = x.size
    weighted = weight is not None
    n_main = (n // LANES) * LANES
    rows = n_main // LANES
    tail = n - n_main

    # Tiny inputs: not worth a kernel launch.
    if rows == 0:
        xf = x.reshape(-1).astype(jnp.float32)
        yf = y.reshape(-1).astype(jnp.float32)
        d = xf - yf
        if weighted:
            wf = weight.reshape(-1).astype(jnp.float32)
            return jnp.sum(d * d * wf) / jnp.sum(wf)
        return jnp.sum(d * d) / jnp.float32(n)

    block_rows = min(MAX_BLOCK_ROWS, _round_up(rows, SUBLANES))
    num_blocks = _ceil_div(rows, block_rows)
    parts = min(_num_tensorcores(), num_blocks)
    steps_per_part = _ceil_div(num_blocks, parts)
    needs_oob_guard = parts * steps_per_part > num_blocks
    needs_ragged = (rows % block_rows) != 0
    tail_rows = rows - (num_blocks - 1) * block_rows   # valid rows, last block

    if needs_oob_guard:
        def in_index(p, i):
            # Clamp so over-covering steps never DMA past the slab.
            return (jnp.minimum(p * steps_per_part + i, num_blocks - 1), 0)
    else:
        def in_index(p, i):
            return (p * steps_per_part + i, 0)

    in_spec = pl.BlockSpec((block_rows, LANES), in_index)
    out_spec = pl.BlockSpec((SUBLANES, LANES), lambda p, i: (p, 0))
    out_sds = jax.ShapeDtypeStruct((parts * SUBLANES, LANES), jnp.float32)
    acc = pltpu.VMEM((SUBLANES, LANES), jnp.float32)

    n_in = 3 if weighted else 2
    block_bytes = block_rows * LANES * 4
    # double-buffered inputs + headroom for any materialized f32 temps.
    vmem_limit = int(n_in * 2 * block_bytes + (n_in + 2) * block_bytes
                     + (2 << 20))
    cparams = pltpu.CompilerParams(
        dimension_semantics=("parallel", "arbitrary"),
        vmem_limit_bytes=vmem_limit)

    itemsize = jnp.dtype(x.dtype).itemsize
    out_bytes = parts * SUBLANES * LANES * 4 * (2 if weighted else 1)
    cost = pl.CostEstimate(
        flops=(5 if weighted else 3) * n_main,
        transcendentals=0,
        bytes_accessed=n_in * n_main * itemsize + out_bytes)

    kernel = _make_kernel(
        weighted=weighted, block_rows=block_rows,
        steps_per_part=steps_per_part, num_blocks=num_blocks,
        tail_rows=tail_rows, needs_ragged=needs_ragged,
        needs_oob_guard=needs_oob_guard)

    xs = _slab(x, rows, n_main, tail)
    ys = _slab(y, rows, n_main, tail)

    if weighted:
        ws = _slab(weight, rows, n_main, tail)
        num, den = pl.pallas_call(
            kernel,
            out_shape=(out_sds, out_sds),
            grid_spec=pltpu.PrefetchScalarGridSpec(
                num_scalar_prefetch=0,
                grid=(parts, steps_per_part),
                in_specs=[in_spec, in_spec, in_spec],
                out_specs=[out_spec, out_spec],
                scratch_shapes=[acc, acc]),
            compiler_params=cparams,
            cost_estimate=cost,
        )(xs, ys, ws)
        total_num = jnp.sum(num)
        total_den = jnp.sum(den)
        if tail:
            t_num, t_den = _tail_sums(x, y, weight, n_main)
            total_num = total_num + t_num
            total_den = total_den + t_den
        return total_num / total_den

    num = pl.pallas_call(
        kernel,
        out_shape=out_sds,
        grid_spec=pltpu.PrefetchScalarGridSpec(
            num_scalar_prefetch=0,
            grid=(parts, steps_per_part),
            in_specs=[in_spec, in_spec],
            out_specs=out_spec,
            scratch_shapes=[acc]),
        compiler_params=cparams,
        cost_estimate=cost,
    )(xs, ys)
    total_num = jnp.sum(num)
    if tail:
        t_num, _ = _tail_sums(x, y, None, n_main)
        total_num = total_num + t_num
    return total_num / jnp.float32(n)


if __name__ == "__main__":
    key = jax.random.PRNGKey(0)
    kx, ky, kw, kx2, ky2, kx3, ky3, kw3 = jax.random.split(key, 8)

    # Case 1 & 2: small NCHW shape (conv-style), aligned path.
    shape = (2, 4, 16, 16)                       # 2048 elements
    x = jax.random.normal(kx, shape, dtype=jnp.float32)
    y = jax.random.normal(ky, shape, dtype=jnp.float32)
    weight = jax.random.uniform(kw, shape, dtype=jnp.float32) + 0.1

    loss_none = jax.block_until_ready(mse_weight_loss(x, y))
    ref_none = jnp.sum((x - y) ** 2) / x.size
    assert jnp.allclose(loss_none, ref_none, rtol=1e-5, atol=1e-6), (
        loss_none, ref_none)

    loss_w = jax.block_until_ready(mse_weight_loss(x, y, weight))
    ref_w = jnp.sum((x - y) ** 2 * weight) / jnp.sum(weight)
    assert jnp.allclose(loss_w, ref_w, rtol=1e-5, atol=1e-6), (loss_w, ref_w)

    # Case 3: ragged element count (exercises gated row mask + jnp tail).
    shape_r = (3, 5, 7, 11)                      # 1155 elements
    xr = jax.random.normal(kx2, shape_r, dtype=jnp.float32)
    yr = jax.random.normal(ky2, shape_r, dtype=jnp.float32)
    wr = jax.random.uniform(kw, shape_r, dtype=jnp.float32) + 0.1
    loss_r = jax.block_until_ready(mse_weight_loss(xr, yr))
    ref_r = jnp.sum((xr - yr) ** 2) / xr.size
    assert jnp.allclose(loss_r, ref_r, rtol=1e-5, atol=1e-6), (loss_r, ref_r)
    loss_rw = jax.block_until_ready(mse_weight_loss(xr, yr, wr))
    ref_rw = jnp.sum((xr - yr) ** 2 * wr) / jnp.sum(wr)
    assert jnp.allclose(loss_rw, ref_rw, rtol=1e-5, atol=1e-6), (loss_rw, ref_rw)

    # Case 4: multi-block weighted path (accumulation across grid steps).
    shape_b = (8, 16, 128, 64)                   # 1,048,576 elements -> 2 blocks
    xb = jax.random.normal(kx3, shape_b, dtype=jnp.float32)
    yb = jax.random.normal(ky3, shape_b, dtype=jnp.float32)
    wb = jax.random.uniform(kw3, shape_b, dtype=jnp.float32) + 0.1
    loss_b = jax.block_until_ready(mse_weight_loss(xb, yb, wb))
    ref_b = jnp.sum((xb - yb) ** 2 * wb) / jnp.sum(wb)
    assert jnp.allclose(loss_b, ref_b, rtol=1e-4, atol=1e-5), (loss_b, ref_b)

    print("KERNEL_OK")
</pallas_src>

<mosaic_0001>
module attributes {stable_mosaic.version = 11 : i64} {
  func.func @kernel(%arg0: i32, %arg1: i32, %arg2: memref<16x128xf32, #tpu.memory_space<vmem>>, %arg3: memref<16x128xf32, #tpu.memory_space<vmem>>, %arg4: memref<8x128xf32, #tpu.memory_space<vmem>>, %arg5: memref<8x128xf32, #tpu.memory_space<vmem>>) attributes {dimension_semantics = [#tpu.dimension_semantics<parallel>, #tpu.dimension_semantics<arbitrary>], iteration_bounds = array<i64: 1, 1>, scalar_prefetch = 0 : i64, scratch_operands = 1 : i64, tpu.core_type = #tpu.core_type<tc>, window_params = [{transform_indices = @transform_0, window_bounds = array<i64: 16, 128>}, {transform_indices = @transform_1, window_bounds = array<i64: 16, 128>}, {transform_indices = @transform_2, window_bounds = array<i64: 8, 128>}]} {
    %c0_i32 = arith.constant 0 : i32
    %0 = arith.cmpi eq, %arg1, %c0_i32 : i32
    %1 = arith.extui %0 : i1 to i32
    %c0_i32_0 = arith.constant 0 : i32
    %2 = arith.cmpi ne, %1, %c0_i32_0 : i32
    scf.if %2 {
      %cst_10 = arith.constant 0.000000e+00 : f32
      %15 = vector.broadcast %cst_10 : f32 to vector<8x128xf32>
      %c0_11 = arith.constant 0 : index
      %c0_12 = arith.constant 0 : index
      %16 = vector.load %arg5[%c0_11, %c0_12] : memref<8x128xf32, #tpu.memory_space<vmem>>, vector<8x128xf32>
      tpu.vector_store %arg5[%c0_11, %c0_12], %15 {strides = array<i32>} : memref<8x128xf32, #tpu.memory_space<vmem>>, vector<8x128xf32>,
    } else {
    }
    %c0 = arith.constant 0 : index
    %c0_1 = arith.constant 0 : index
    %3 = vector.load %arg2[%c0, %c0_1] : memref<16x128xf32, #tpu.memory_space<vmem>>, vector<16x128xf32>
    %c0_2 = arith.constant 0 : index
    %c0_3 = arith.constant 0 : index
    %4 = vector.load %arg3[%c0_2, %c0_3] : memref<16x128xf32, #tpu.memory_space<vmem>>, vector<16x128xf32>
    %5 = arith.subf %3, %4 : vector<16x128xf32>
    %6 = arith.mulf %5, %5 : vector<16x128xf32>
    %c0_4 = arith.constant 0 : index
    %c0_5 = arith.constant 0 : index
    %7 = vector.load %arg5[%c0_4, %c0_5] : memref<8x128xf32, #tpu.memory_space<vmem>>, vector<8x128xf32>
    %8 = vector.shape_cast %6 : vector<16x128xf32> to vector<2x8x128xf32>
    %cst = arith.constant dense<0.000000e+00> : vector<8x128xf32>
    %9 = vector.multi_reduction <add>, %8, %cst [0] : vector<2x8x128xf32> to vector<8x128xf32>
    %10 = arith.addf %7, %9 : vector<8x128xf32>
    %c0_6 = arith.constant 0 : index
    %c0_7 = arith.constant 0 : index
    %11 = vector.load %arg5[%c0_6, %c0_7] : memref<8x128xf32, #tpu.memory_space<vmem>>, vector<8x128xf32>
    tpu.vector_store %arg5[%c0_6, %c0_7], %10 {strides = array<i32>} : memref<8x128xf32, #tpu.memory_space<vmem>>, vector<8x128xf32>,
    %c0_i32_8 = arith.constant 0 : i32
    %12 = arith.cmpi eq, %arg1, %c0_i32_8 : i32
    %13 = arith.extui %12 : i1 to i32
    %c0_i32_9 = arith.constant 0 : i32
    %14 = arith.cmpi ne, %13, %c0_i32_9 : i32
    scf.if %14 {
      %c0_10 = arith.constant 0 : index
      %c0_11 = arith.constant 0 : index
      %15 = vector.load %arg5[%c0_10, %c0_11] : memref<8x128xf32, #tpu.memory_space<vmem>>, vector<8x128xf32>
      %c0_12 = arith.constant 0 : index
      %c0_13 = arith.constant 0 : index
      %16 = vector.load %arg4[%c0_12, %c0_13] : memref<8x128xf32, #tpu.memory_space<vmem>>, vector<8x128xf32>
      tpu.vector_store %arg4[%c0_12, %c0_13], %15 {strides = array<i32>} : memref<8x128xf32, #tpu.memory_space<vmem>>, vector<8x128xf32>,
    } else {
    }
    return
  }
  func.func @transform_0(%arg0: i32, %arg1: i32) -> (i32, i32) {
    %c1_i32 = arith.constant 1 : i32
    %0 = arith.muli %arg0, %c1_i32 : i32
    %1 = arith.addi %0, %arg1 : i32
    %c0_i32 = arith.constant 0 : i32
    %c0_i32_0 = arith.constant 0 : i32
    return %1, %c0_i32 : i32, i32
  }
  func.func @transform_1(%arg0: i32, %arg1: i32) -> (i32, i32) {
    %c1_i32 = arith.constant 1 : i32
    %0 = arith.muli %arg0, %c1_i32 : i32
    %1 = arith.addi %0, %arg1 : i32
    %c0_i32 = arith.constant 0 : i32
    %c0_i32_0 = arith.constant 0 : i32
    return %1, %c0_i32 : i32, i32
  }
  func.func @transform_2(%arg0: i32, %arg1: i32) -> (i32, i32) {
    %c0_i32 = arith.constant 0 : i32
    %c0_i32_0 = arith.constant 0 : i32
    return %arg0, %c0_i32 : i32, i32
  }
}

</mosaic_0001>

<bundles_post_ra>
// kernel: tpu_custom_call.1
= control target key start
LH: loop header
LB: loop body
LE: loop exit
PB: predicated region body
PF: predicated region fallthrough
CT: control target
= control target key end

     0   :  { %7 = vsyncpa [#allocation4], 0  ;;  %s223_s0 = inlined_call_operand.hbm [shape: f32[16,128], index: 0, kind: input, shape index: {}]   ;;  %s224_s1 = inlined_call_operand.hbm [shape: f32[16,128], index: 1, kind: input, shape index: {}]   ;;  %s225_s2 = inlined_call_operand.hbm [shape: f32[8,128], index: 2, kind: output, shape index: {}]  }
   0x1   :  { %8 = vsyncpa [#allocation7], 0 }
   0x2   :  { %9 = vsyncpa [#allocation5], 0  ;;  %s167_s9 = smov [#allocation3]   ;;  %s95_s13 = scalar_lea.hbm %s223_s0, 256 }
   0x3   :  { %s19_s10 = sshll.u32 %s167_s9, 4  ;;  %p96_p0 = scmp.ne.s32.totalorder %s223_s0, %s95_s13  ;;  %s20_s10 = int_to_ptr.vmem [resolvable:$true] %s19_s10 }
   0x4   :  { %p99_p1 = scmp.lt.u32.totalorder %s95_s13, %s223_s0 }
   0x6   :  { %p101_p2 = pnand %p99_p1, %p96_p0 }
   0x8   :  { %104 = shalt.err (!%p101_p2)
}
   0x9   :  { %s105_s18 = scalar_lea.vmem %s20_s10, 256  ;;  %p110_p4 = scmp.lt.s32.totalorder %s20_s10, %s20_s10 }
   0xa   :  { %p106_p3 = scmp.ne.s32.totalorder %s20_s10, %s105_s18  ;;  %p111_p5 = scmp.lt.s32.totalorder %s105_s18, %s105_s18 }
   0xc   :  { %p112_p6 = por %p111_p5, %p110_p4 }
   0xe   :  { %p113_p7 = pnand %p112_p6, %p106_p3 }
  0x10   :  { %116 = shalt.err (!%p113_p7)
}
  0x11   :  { %s168_s19 = smov 128   ;;  %s169_s20 = smov 8  }
  0x12   :  { %25 = dma.hbm_to_vmem [thread:$0]  %s223_s0, 256, %s20_s10, [#allocation4], %s168_s19, %s168_s19, %s169_s20  }
  0x13   :  { %s170_s23 = smov [#allocation6]   ;;  %s117_s27 = scalar_lea.hbm %s224_s1, 256 }
  0x14   :  { %s35_s24 = sshll.u32 %s170_s23, 4  ;;  %p118_p8 = scmp.ne.s32.totalorder %s224_s1, %s117_s27  ;;  %s36_s24 = int_to_ptr.vmem [resolvable:$true] %s35_s24 }
  0x15   :  { %p121_p9 = scmp.lt.u32.totalorder %s117_s27, %s224_s1 }
  0x17   :  { %p123_p10 = pnand %p121_p9, %p118_p8 }
  0x19   :  { %126 = shalt.err (!%p123_p10)
}
  0x1a   :  { %s127_s4 = scalar_lea.vmem %s36_s24, 256  ;;  %p132_p12 = scmp.lt.s32.totalorder %s36_s24, %s36_s24 }
  0x1b   :  { %p128_p11 = scmp.ne.s32.totalorder %s36_s24, %s127_s4  ;;  %p133_p13 = scmp.lt.s32.totalorder %s127_s4, %s127_s4 }
  0x1d   :  { %p134_p0 = por %p133_p13, %p132_p12 }
  0x1f   :  { %p135_p1 = pnand %p134_p0, %p128_p11 }
  0x21   :  { %138 = shalt.err (!%p135_p1)
}
  0x22   :  { %41 = dma.hbm_to_vmem [thread:$0]  %s224_s1, 256, %s36_s24, [#allocation7], %s168_s19, %s168_s19, %s169_s20  }
  0x23   :  { %161 = dma.done.wait [#allocation4], 256  }
  0x24   :  { %162 = vsyncadd [#allocation4], 4294967040 }
  0x25   :  { %163 = dma.done.wait [#allocation7], 256  }
  0x26   :  { %164 = vsyncadd [#allocation7], 4294967040  ;;  %v57_v0 = vld [vmem:[#allocation3] sm:$0xff]  ;;  %v58_v1 = vld [vmem:[#allocation3 + $0x8] sm:$0xff]  ;;  %s171_s6 = smov [#allocation8]  }
  0x27   :  { %v59_v2 = vld [vmem:[#allocation6] sm:$0xff]  ;;  %v60_v3 = vld [vmem:[#allocation6 + $0x8] sm:$0xff]  ;;  %s80_s7 = sshll.u32 %s171_s6, 4  ;;  %s81_s7 = int_to_ptr.vmem [resolvable:$true] %s80_s7 }
  0x28   :  { %v61_v4 = vsub.f32 %v57_v0, %v59_v2  ;;  %v62_v5 = vsub.f32 %v58_v1, %v60_v3  ;;  %s139_s8 = scalar_lea.vmem %s81_s7, 128  ;;  %p144_p3 = scmp.lt.s32.totalorder %s81_s7, %s81_s7 }
  0x29   :  { %p140_p2 = scmp.ne.s32.totalorder %s81_s7, %s139_s8  ;;  %p145_p4 = scmp.lt.s32.totalorder %s139_s8, %s139_s8 }
  0x2a   :  { %v63_v6 = vmul.f32 %v61_v4, %v61_v4  ;;  %v64_v7 = vmul.f32 %v62_v5, %v62_v5 }
  0x2b   :  { %p146_p5 = por %p145_p4, %p144_p3 }
  0x2c   :  { %v66_v8 = vadd.f32 %v64_v7, %v63_v6 }
  0x2d   :  { %p147_p6 = pnand %p146_p5, %p140_p2 }
  0x2e   :  { %73 = vst [vmem:[#allocation8] sm:$0xff] %v66_v8 }
  0x2f   :  { %150 = shalt.err (!%p147_p6)
}
  0x30   :  { %s151_s10 = scalar_lea.hbm %s225_s2, 128 }
  0x31   :  { %p152_p7 = scmp.ne.s32.totalorder %s225_s2, %s151_s10  ;;  %p155_p8 = scmp.lt.u32.totalorder %s151_s10, %s225_s2 }
  0x33   :  { %p157_p9 = pnand %p155_p8, %p152_p7 }
  0x35   :  { %160 = shalt.err (!%p157_p9)
}
  0x36   :  { %83 = dma.vmem_to_hbm [thread:$0]  %s81_s7, 128, %s225_s2, [#allocation5]  }
  0x37   :  { %165 = dma.done.wait [#allocation5], 128  }
  0x38   :  { %166 = vsyncadd [#allocation5], 4294967168 }
  0x39   :  { %87 = vsyncpa [#allocation4], 1 }
  0x3a   :  { %88 = vsyncpa [#allocation7], 1 }
  0x3b   :  { %89 = vsyncpa [#allocation5], 1 }

</bundles_post_ra>
